<compile_context>
chip_gen: v7x
topology: tpu7x:2x2x1
jax: 0.10.0
libtpu: 0.0.40
codegen_flags: <defaults>
</compile_context>

<pallas_src>
import jax
import jax.numpy as jnp
from jax.experimental import pallas as pl
from jax.experimental.pallas import tpu as pltpu

N_IN = 64
N_HID = 128


def chessnet_kernel(x_ref, w1_ref, b1_ref, w2_ref, b2_ref, o_ref):
    # x: (TB, 64) | w1: (64, 128) | b1: (1, 128) | w2: (1, 128) | b2: (1,1) SMEM
    # o: (1, TB)  -- lane-dense row of per-board scores.
    h = jnp.dot(x_ref[...], w1_ref[...], preferred_element_type=jnp.float32)
    h = jnp.maximum(h + b1_ref[...], 0.0)  # ReLU
    # Second layer (128 -> 1): contract w2 (1,128) against h (TB,128) over the
    # hidden dim on the MXU -> (1, TB).  Keeps the output lane-dense.
    row = jax.lax.dot_general(
        w2_ref[...], h,
        dimension_numbers=(((1,), (1,)), ((), ())),
        preferred_element_type=jnp.float32,
    )
    o_ref[...] = (row + b2_ref[0, 0]).astype(o_ref.dtype)


def _round_up(n, m):
    return ((n + m - 1) // m) * m


def _pick_tile(B, tb):
    """Batch tile: multiple of 8 (sublanes); in the multi-tile case also a
    multiple of 128 so the (1, TB) output block is lane-dense, and capped at
    ~half the batch so v7x's two TensorCores both get grid steps."""
    half = _round_up((B + 1) // 2, 128)
    te = min(_round_up(max(tb, 8), 128), half)
    if te >= B:
        te = _round_up(max(B, 1), 8)  # whole batch fits in one tile
    return max(te, 8)


def chessnet_forward(x, w1, b1, w2, b2, *, tb=8192):
    """Fused MLP forward. x: (B, 64) float32 -> (B, 1) float32."""
    B = x.shape[0]
    tb_eff = _pick_tile(B, tb)
    n_tiles = pl.cdiv(B, tb_eff)
    B_pad = n_tiles * tb_eff  # only the output is tile-padded; x is read ragged

    b1_2d = b1.reshape(1, N_HID).astype(jnp.float32)
    w2_row = w2.reshape(1, N_HID).astype(jnp.float32)
    b2_2d = b2.reshape(1, 1).astype(jnp.float32)

    cost = pl.CostEstimate(
        flops=2 * B_pad * N_IN * N_HID + 4 * B_pad * N_HID,
        transcendentals=0,
        bytes_accessed=(B * N_IN * 4 + B * 4                      # x in, out
                        + N_IN * N_HID * 4 + 2 * N_HID * 4 + 4),  # weights/biases
    )

    out_row = pl.pallas_call(
        chessnet_kernel,
        out_shape=jax.ShapeDtypeStruct((1, B_pad), jnp.float32),
        grid=(n_tiles,),
        in_specs=[
            pl.BlockSpec((tb_eff, N_IN), lambda i: (i, 0)),      # x tile (pipelined, ragged tail OK)
            pl.BlockSpec((N_IN, N_HID), lambda i: (0, 0)),       # w1 resident
            pl.BlockSpec((1, N_HID), lambda i: (0, 0)),          # b1 resident
            pl.BlockSpec((1, N_HID), lambda i: (0, 0)),          # w2 as a lane row
            pl.BlockSpec(memory_space=pltpu.MemorySpace.SMEM),   # b2 scalar
        ],
        out_specs=pl.BlockSpec((1, tb_eff), lambda i: (0, i)),   # lane-dense row
        compiler_params=pltpu.CompilerParams(
            dimension_semantics=("parallel",),      # megacore sharding on v7x
            vmem_limit_bytes=32 * 1024 * 1024,      # headroom for tb=8192 tiles
        ),
        cost_estimate=cost,
    )(x.astype(jnp.float32), w1.astype(jnp.float32), b1_2d, w2_row, b2_2d)

    # Padded tail columns correspond to out-of-bounds input rows; drop them.
    return out_row[0, :B].reshape(B, 1)


def init_params(key):
    """Deterministic init mimicking PyTorch nn.Linear default U[-1/sqrt(fan_in), +1/sqrt(fan_in)]."""
    k1, k2, k3, k4 = jax.random.split(key, 4)
    bound1 = 1.0 / jnp.sqrt(64.0)
    bound2 = 1.0 / jnp.sqrt(128.0)
    # Stored transposed relative to PyTorch (out_features, in_features) -> (in, out).
    w1 = jax.random.uniform(k1, (N_IN, N_HID), jnp.float32, -bound1, bound1)
    b1 = jax.random.uniform(k2, (N_HID,), jnp.float32, -bound1, bound1)
    w2 = jax.random.uniform(k3, (N_HID, 1), jnp.float32, -bound2, bound2)
    b2 = jax.random.uniform(k4, (1,), jnp.float32, -bound2, bound2)
    return w1, b1, w2, b2


if __name__ == "__main__":
    key = jax.random.PRNGKey(0)
    kp = jax.random.fold_in(key, 7)
    w1, b1, w2, b2 = init_params(kp)

    def ref_fwd(x):
        return jnp.maximum(x @ w1 + b1, 0.0) @ w2 + b2

    # (batch, tile) cases: single small tile, ragged multi-tile, two balanced
    # 128-multiple tiles (exercises the v7x two-tile path and lane-dense output).
    for case_idx, (B, tb) in enumerate(((8, 8192), (300, 128), (1024, 8192))):
        x = jax.random.normal(jax.random.fold_in(key, case_idx), (B, N_IN), jnp.float32)
        out = jax.block_until_ready(chessnet_forward(x, w1, b1, w2, b2, tb=tb))
        assert out.shape == (B, 1)
        ref = ref_fwd(x)
        assert jnp.allclose(out, ref, atol=2e-5, rtol=2e-5), f"mismatch at B={B}"

    print("KERNEL_OK")
</pallas_src>

<mosaic_0001>
module attributes {stable_mosaic.version = 11 : i64} {
  func.func @chessnet_kernel(%arg0: i32, %arg1: memref<8x64xf32, #tpu.memory_space<vmem>>, %arg2: memref<64x128xf32, #tpu.memory_space<vmem>>, %arg3: memref<1x128xf32, #tpu.memory_space<vmem>>, %arg4: memref<1x128xf32, #tpu.memory_space<vmem>>, %arg5: memref<1x1xf32, #tpu.memory_space<smem>>, %arg6: memref<1x8xf32, #tpu.memory_space<vmem>>) attributes {dimension_semantics = [#tpu.dimension_semantics<parallel>], iteration_bounds = array<i64: 1>, scalar_prefetch = 0 : i64, scratch_operands = 0 : i64, tpu.core_type = #tpu.core_type<tc>, window_params = [{transform_indices = @transform_0, window_bounds = array<i64: 8, 64>}, {pipeline_mode = #tpu.pipeline_mode<synchronous>, transform_indices = @transform_1, window_bounds = array<i64: 64, 128>}, {pipeline_mode = #tpu.pipeline_mode<synchronous>, transform_indices = @transform_2, window_bounds = array<i64: 1, 128>}, {pipeline_mode = #tpu.pipeline_mode<synchronous>, transform_indices = @transform_3, window_bounds = array<i64: 1, 128>}, {transform_indices = @transform_4, window_bounds = array<i64: 1, 1>}, {transform_indices = @transform_5, window_bounds = array<i64: 1, 8>}]} {
    %c0 = arith.constant 0 : index
    %c0_0 = arith.constant 0 : index
    %0 = vector.load %arg1[%c0, %c0_0] : memref<8x64xf32, #tpu.memory_space<vmem>>, vector<8x64xf32>
    %c0_1 = arith.constant 0 : index
    %c0_2 = arith.constant 0 : index
    %1 = vector.load %arg2[%c0_1, %c0_2] : memref<64x128xf32, #tpu.memory_space<vmem>>, vector<64x128xf32>
    %cst = arith.constant dense<0.000000e+00> : vector<8x128xf32>
    %2 = tpu.matmul %0, %1, %cst {dimension_numbers = #tpu.dot_dimension_numbers<[1], [0], [0], [1], [0, 0, 1, 1], [], []>} : vector<8x64xf32>, vector<64x128xf32>, vector<8x128xf32> -> vector<8x128xf32>
    %c0_3 = arith.constant 0 : index
    %c0_4 = arith.constant 0 : index
    %3 = vector.load %arg3[%c0_3, %c0_4] : memref<1x128xf32, #tpu.memory_space<vmem>>, vector<1x128xf32>
    %4 = vector.broadcast %3 : vector<1x128xf32> to vector<8x128xf32>
    %5 = arith.addf %2, %4 : vector<8x128xf32>
    %cst_5 = arith.constant 0.000000e+00 : f32
    %6 = vector.broadcast %cst_5 : f32 to vector<8x128xf32>
    %7 = arith.maximumf %5, %6 : vector<8x128xf32>
    %c0_6 = arith.constant 0 : index
    %c0_7 = arith.constant 0 : index
    %8 = vector.load %arg4[%c0_6, %c0_7] : memref<1x128xf32, #tpu.memory_space<vmem>>, vector<1x128xf32>
    %cst_8 = arith.constant dense<0.000000e+00> : vector<1x8xf32>
    %9 = tpu.matmul %8, %7, %cst_8 {dimension_numbers = #tpu.dot_dimension_numbers<[1], [1], [0], [0], [0, 0, 1, 0], [], []>} : vector<1x128xf32>, vector<8x128xf32>, vector<1x8xf32> -> vector<1x8xf32>
    %c0_9 = arith.constant 0 : index
    %c0_10 = arith.constant 0 : index
    %10 = memref.load %arg5[%c0_9, %c0_10] : memref<1x1xf32, #tpu.memory_space<smem>>
    %11 = vector.broadcast %10 : f32 to vector<1x8xf32>
    %12 = arith.addf %9, %11 : vector<1x8xf32>
    %c0_11 = arith.constant 0 : index
    %c0_12 = arith.constant 0 : index
    %13 = vector.load %arg6[%c0_11, %c0_12] : memref<1x8xf32, #tpu.memory_space<vmem>>, vector<1x8xf32>
    tpu.vector_store %arg6[%c0_11, %c0_12], %12 {strides = array<i32>} : memref<1x8xf32, #tpu.memory_space<vmem>>, vector<1x8xf32>,
    return
  }
  func.func @transform_0(%arg0: i32) -> (i32, i32) {
    %c0_i32 = arith.constant 0 : i32
    %c0_i32_0 = arith.constant 0 : i32
    return %arg0, %c0_i32 : i32, i32
  }
  func.func @transform_1(%arg0: i32) -> (i32, i32) {
    %c0_i32 = arith.constant 0 : i32
    %c0_i32_0 = arith.constant 0 : i32
    %c0_i32_1 = arith.constant 0 : i32
    return %c0_i32, %c0_i32_0 : i32, i32
  }
  func.func @transform_2(%arg0: i32) -> (i32, i32) {
    %c0_i32 = arith.constant 0 : i32
    %c0_i32_0 = arith.constant 0 : i32
    %c0_i32_1 = arith.constant 0 : i32
    return %c0_i32, %c0_i32_0 : i32, i32
  }
  func.func @transform_3(%arg0: i32) -> (i32, i32) {
    %c0_i32 = arith.constant 0 : i32
    %c0_i32_0 = arith.constant 0 : i32
    %c0_i32_1 = arith.constant 0 : i32
    return %c0_i32, %c0_i32_0 : i32, i32
  }
  func.func @transform_4(%arg0: i32) -> (i32, i32) {
    %c0_i32 = arith.constant 0 : i32
    %c0_i32_0 = arith.constant 0 : i32
    %c0_i32_1 = arith.constant 0 : i32
    return %c0_i32, %c0_i32_0 : i32, i32
  }
  func.func @transform_5(%arg0: i32) -> (i32, i32) {
    %c0_i32 = arith.constant 0 : i32
    %c0_i32_0 = arith.constant 0 : i32
    return %c0_i32, %arg0 : i32, i32
  }
}

</mosaic_0001>

<bundles_post_ra>
// kernel: tpu_custom_call.1
= control target key start
LH: loop header
LB: loop body
LE: loop exit
PB: predicated region body
PF: predicated region fallthrough
CT: control target
= control target key end

     0   :  { %11 = vsyncpa [#allocation4], 0  ;;  %s449_s0 = inlined_call_operand.hbm [shape: f32[8,64], index: 0, kind: input, shape index: {}]   ;;  %s450_s1 = inlined_call_operand.hbm [shape: f32[64,128], index: 1, kind: input, shape index: {}]   ;;  %s451_s2 = inlined_call_operand.vmem [shape: f32[1,128], index: 2, kind: input, shape index: {}]   ;;  %s452_s3 = inlined_call_operand.vmem [shape: f32[1,128], index: 3, kind: input, shape index: {}]   ;;  %s453_s4 = inlined_call_operand.<no memory space> [shape: f32[1,1], index: 4, kind: input, shape index: {}]   ;;  %s454_s5 = inlined_call_operand.hbm [shape: f32[1,8], index: 5, kind: output, shape index: {}]  }
   0x1   :  { %12 = vsyncpa [#allocation7], 0 }
   0x2   :  { %13 = vsyncpa [#allocation5], 0  ;;  %s359_s18 = smov [#allocation3]   ;;  %s360_s20 = smov [#allocation6]  }
   0x3   :  { %s20_s19 = sshll.u32 %s359_s18, 4  ;;  %s29_s21 = sshll.u32 %s360_s20, 4  ;;  %s21_s19 = int_to_ptr.vmem [resolvable:$true] %s20_s19  ;;  %s397_s21 = int_to_ptr.vmem [resolvable:$true] %s29_s21 }
   0x4   :  { %s287_s24 = scalar_lea.hbm %s449_s0, 128 }
   0x5   :  { %p288_p0 = scmp.ne.s32.totalorder %s449_s0, %s287_s24  ;;  %p291_p1 = scmp.lt.u32.totalorder %s287_s24, %s449_s0 }
   0x7   :  { %p293_p2 = pnand %p291_p1, %p288_p0 }
   0x9   :  { %296 = shalt.err (!%p293_p2)
}
   0xa   :  { %s297_s29 = scalar_lea.vmem %s21_s19, 128  ;;  %p302_p4 = scmp.lt.s32.totalorder %s21_s19, %s21_s19 }
   0xb   :  { %p298_p3 = scmp.ne.s32.totalorder %s21_s19, %s297_s29  ;;  %p303_p5 = scmp.lt.s32.totalorder %s297_s29, %s297_s29 }
   0xd   :  { %p304_p6 = por %p303_p5, %p302_p4 }
   0xf   :  { %p305_p7 = pnand %p304_p6, %p298_p3 }
  0x11   :  { %308 = shalt.err (!%p305_p7)
}
  0x12   :  { %23 = dma.hbm_to_vmem [thread:$0]  %s449_s0, 128, %s21_s19, [#allocation4]  }
  0x13   :  { %s309_s9 = scalar_lea.hbm %s450_s1, 1024 }
  0x14   :  { %p310_p8 = scmp.ne.s32.totalorder %s450_s1, %s309_s9  ;;  %p313_p9 = scmp.lt.u32.totalorder %s309_s9, %s450_s1 }
  0x16   :  { %p315_p10 = pnand %p313_p9, %p310_p8 }
  0x18   :  { %318 = shalt.err (!%p315_p10)
}
  0x19   :  { %s319_s14 = scalar_lea.vmem %s397_s21, 1024  ;;  %p324_p12 = scmp.lt.s32.totalorder %s397_s21, %s397_s21 }
  0x1a   :  { %p320_p11 = scmp.ne.s32.totalorder %s397_s21, %s319_s14  ;;  %p325_p13 = scmp.lt.s32.totalorder %s319_s14, %s319_s14 }
  0x1c   :  { %p326_p0 = por %p325_p13, %p324_p12 }
  0x1e   :  { %p327_p1 = pnand %p326_p0, %p320_p11 }
  0x20   :  { %330 = shalt.err (!%p327_p1)
}
  0x21   :  { %s361_s0 = smov 128   ;;  %s362_s15 = smov 8  }
  0x22   :  { %35 = dma.hbm_to_vmem [thread:$0]  %s450_s1, 1024, %s397_s21, [#allocation7], %s361_s0, %s361_s0, %s362_s15  }
  0x23   :  { %353 = dma.done.wait [#allocation4], 128  }
  0x24   :  { %354 = vsyncadd [#allocation4], 4294967168 }
  0x25   :  { %355 = dma.done.wait [#allocation7], 1024  }
  0x26   :  { %356 = vsyncadd [#allocation7], 4294966272  ;;  %v363_v0 = vmov 0.0|0.0   ;;  %vm364_vm0 = vmmov 0   ;;  %v365_v1 = vmov 0.0   ;;  %v49_v2 = vld [vmem:[#allocation6] sm:$0xff]  ;;  %v141_v21 = vstv %s453_s4 }
  0x27   :  { %267 = vmatprep.subr.bf16.mxu0 %v363_v0  ;;  %259 = vmatprep.mubr.msk.f32.mxu0 %vm364_vm0, %v365_v1  ;;  %v50_v3 = vld [vmem:[#allocation6 + $0x8] sm:$0xff]  ;;  %v51_v4 = vld [vmem:[#allocation6 + $0x10] sm:$0xff]  ;;  %v52_v6 = vld [vmem:[#allocation6 + $0x18] sm:$0xff]  ;;  %vm64_vm1 = vcmask 523264   ;;  %s366_s23 = smov [#allocation8]   ;;  %vm212_vm2 = vcmask 57344  }
  0x28   :  { %262 = vmatprep.subr.mxu1 %v365_v1  ;;  %264 = vmatprep.mubr.msk.f32.mxu1 %vm364_vm0, %v365_v1  ;;  %v268_v5 = vpack.c.bf16 %v50_v3, %v49_v2  ;;  %v271_v7 = vpack.c.bf16 %v52_v6, %v51_v4  ;;  %v53_v8 = vld [vmem:[#allocation6 + $0x20] sm:$0xff]  ;;  %v54_v9 = vld [vmem:[#allocation6 + $0x28] sm:$0xff]  ;;  %v55_v11 = vld [vmem:[#allocation6 + $0x30] sm:$0xff]  ;;  %s220_s24 = sshll.u32 %s366_s23, 4  ;;  %s221_s24 = int_to_ptr.vmem [resolvable:$true] %s220_s24 }
  0x29   :  { %v274_v10 = vpack.c.bf16 %v54_v9, %v53_v8  ;;  %v56_v12 = vld [vmem:[#allocation6 + $0x38] sm:$0xff]  ;;  %s335_s25 = scalar_lea.vmem %s221_s24, 32  ;;  %p336_p3 = scmp.lt.s32.totalorder %s221_s24, %s221_s24 }
  0x2a   :  { %269 = vmatpush3.bf16.msra.mxu0 %v268_v5  ;;  %v277_v13 = vpack.c.bf16 %v56_v12, %v55_v11  ;;  %v48_v14 = vld [vmem:[#allocation3] sm:$0xff] }
  0x2b   :  { %270 = vmatprep.subr.bf16.mxu0 %v363_v0  ;;  %v230_v15 = vld [vmem:[%s451_s2] ss:$0 sm:$0xff]  ;;  %s331_s2 = scalar_lea.vmem %s221_s24, 16 }
  0x2c   :  { %v139_v20 = vld [vmem:[%s452_s3] sm:$0x1]  ;;  %p332_p2 = scmp.ne.s32.totalorder %s221_s24, %s331_s2  ;;  %p337_p4 = scmp.lt.s32.totalorder %s335_s25, %s331_s2 }
  0x2e   :  { %272 = vmatpush3.bf16.msra.mxu0 %v271_v7  ;;  %p338_p5 = por %p337_p4, %p336_p3 }
  0x2f   :  { %273 = vmatprep.subr.bf16.mxu0 %v363_v0 }
  0x30   :  { %p339_p6 = pnand %p338_p5, %p332_p2 }
  0x32   :  { %275 = vmatpush3.bf16.msra.mxu0 %v274_v10 }
  0x33   :  { %276 = vmatprep.subr.bf16.mxu0 %v363_v0 }
  0x36   :  { %278 = vmatpush3.bf16.msra.mxu0 %v277_v13 }
  0x39   :  { %260 = vmatmul.mubr.msk.f32.vlgmr.msra.gmra.mrb[0].mxu0 %vm64_vm1, %v48_v14 }
 0x10c   :  { %v134_v16 = vpop.f32.mrb[0].mxu0 }
 0x10d   :  { %v135_v17 = vadd.f32 %v230_v15, %v134_v16  ;;  %v261_v18 = vpop.f32.mrb[1].mxu0 }
 0x10f   :  { %v138_v19 = vmax.f32 %v135_v17, 0.0 }
 0x111   :  { %263 = vmatpush3.xpose.msra.mxu1 %v138_v19 }
 0x114   :  { %265 = vmatmul.mubr.f32.vlgmr.msra.gmra.mrb[0].mxu1 %v139_v20 }
 0x1e7   :  { %v208_v22 = vpop.f32.mrb[0].mxu1 }
 0x1e8   :  { %v209_v23 = vadd.f32 %v208_v22, %v141_v21  ;;  %v266_v24 = vpop.f32.mrb[1].mxu1 }
 0x1ea   :  { %213 = vst.msk [vmem:[#allocation8] sm:$0x1] %vm212_vm2, %v209_v23 }
 0x1eb   :  { %342 = shalt.err (!%p339_p6)
}
 0x1ec   :  { %s343_s4 = scalar_lea.hbm %s454_s5, 16 }
 0x1ed   :  { %p344_p7 = scmp.ne.s32.totalorder %s454_s5, %s343_s4  ;;  %p347_p8 = scmp.lt.u32.totalorder %s343_s4, %s454_s5 }
 0x1ef   :  { %p349_p9 = pnand %p347_p8, %p344_p7 }
 0x1f1   :  { %352 = shalt.err (!%p349_p9)
}
 0x1f2   :  { %223 = dma.vmem_to_hbm [thread:$0]  %s221_s24, 16, %s454_s5, [#allocation5]  }
 0x1f3   :  { %357 = dma.done.wait [#allocation5], 16  }
 0x1f4   :  { %358 = vsyncadd [#allocation5], 4294967280 }
 0x1f5   :  { %227 = vsyncpa [#allocation4], 1 }
 0x1f6   :  { %228 = vsyncpa [#allocation7], 1 }
 0x1f7   :  { %229 = vsyncpa [#allocation5], 1 }

</bundles_post_ra>
